<compile_context>
chip_gen: v6e
topology: v6e:2x2x1
jax: 0.10.0
libtpu: 0.0.40
codegen_flags: <defaults>
</compile_context>

<pallas_src>
import functools

import jax
import jax.numpy as jnp
from jax.experimental import pallas as pl
from jax.experimental.pallas import tpu as pltpu

_EPS = 1e-10


def _softmax_rows(logits):
    m = jnp.max(logits, axis=-1, keepdims=True)
    e = jnp.exp(logits - m)
    return e / jnp.sum(e, axis=-1, keepdims=True)


def _iic(z, zt):
    """IIC mutual-information term for cluster assignments z, zt: [B, K] -> (1, 1)."""
    tn = (((0,), (0,)), ((), ()))  # contract over the batch axis: z^T @ zt on the MXU
    P = jax.lax.dot_general(z, zt, dimension_numbers=tn,
                            preferred_element_type=jnp.float32)      # [K, K]
    Pt = jax.lax.dot_general(zt, z, dimension_numbers=tn,
                             preferred_element_type=jnp.float32)     # == P.T (second tiny matmul)
    s = jnp.sum(P, keepdims=True)                                    # sum of the *original* P
    P = (P + Pt) * 0.5 / s
    P = jnp.maximum(P, _EPS)
    Pi = jnp.sum(P, axis=1, keepdims=True)                           # [K, 1] row marginal
    Pj = jnp.sum(P, axis=0, keepdims=True)                           # [1, K] col marginal
    val = P * (jnp.log(Pi) + jnp.log(Pj) - jnp.log(P))
    return jnp.sum(val, keepdims=True)                               # (1, 1)


def mi_da_kernel(xa_ref, xb_ref, xc_ref, wt_ref, out_ref,
                 acc_a, acc_b, acc_c, *, batch, inv_hw):
    step = pl.program_id(0)
    last = pl.num_programs(0) - 1

    @pl.when(step == 0)
    def _init():
        acc_a[...] = jnp.zeros_like(acc_a)
        acc_b[...] = jnp.zeros_like(acc_b)
        acc_c[...] = jnp.zeros_like(acc_c)

    # Accumulate per-(b, c) partial spatial sums in f32 (inputs may be bf16 on the wire).
    acc_a[...] += jnp.sum(xa_ref[...].astype(jnp.float32), axis=-1)
    acc_b[...] += jnp.sum(xb_ref[...].astype(jnp.float32), axis=-1)
    acc_c[...] += jnp.sum(xc_ref[...].astype(jnp.float32), axis=-1)

    @pl.when(step == last)
    def _finalize():
        w = wt_ref[...]                                              # [C, K] f32

        def head(acc_sums):
            # Conv2d(1x1, no bias) and global average pooling commute: logits = mean_hw(x) @ W^T.
            logits = jnp.dot(acc_sums * inv_hw, w,
                             preferred_element_type=jnp.float32)      # [B, K]
            return _softmax_rows(logits)

        za = head(acc_a[...])
        zb = head(acc_b[...])
        zc = head(acc_c[...])
        loss = _iic(za, zb) + _iic(zb, zc) + _iic(zc, za)             # (1, 1)
        # Reference: (IIC(a,b)+IIC(b,c)+IIC(c,a)) / (3 * i_a.shape[0])  -> divide by 3*B.
        out_ref[...] = loss * (1.0 / (3.0 * batch))


def _pick_hw_tile(hw, b, c, itemsize, block_budget_bytes=2 * 1024 * 1024):
    """Largest multiple-of-128 tile that divides H*W and keeps 3 inputs x 2 pipeline buffers
    well inside the default scoped VMEM limit on every generation (16 MiB on v5e)."""
    if hw % 128 != 0:
        # TODO(synk): for tiny spatial extents (< 128 lanes) with many channels, a [B*C, H*W]
        # layout tiled over the sublane (B*C) axis would be the better streaming tiling.
        return hw
    best = 128
    t = 128
    while t <= hw:
        if hw % t == 0 and b * c * t * itemsize <= block_budget_bytes:
            best = t
        t += 128
    return best


def forward_da(a, b, c, conv_weight, *, hw_tile=None):
    """a, b, c: [B, C_in, H, W] backbone feature maps (any float dtype);
    conv_weight: [K, C_in, 1, 1] cluster-head 1x1 conv weight (no bias)."""
    B, C, H, W = a.shape
    K = conv_weight.shape[0]
    HW = H * W

    # Keep the native dtype on the wire (reshape is free; no extra HBM astype pass).
    xa = a.reshape(B, C, HW)
    xb = b.reshape(B, C, HW)
    xc = c.reshape(B, C, HW)
    w_t = conv_weight.reshape(K, C).T.astype(jnp.float32)             # [C_in, K], tiny

    if hw_tile is None:
        hw_tile = _pick_hw_tile(HW, B, C, xa.dtype.itemsize)
    if HW % hw_tile != 0:
        raise ValueError(f"hw_tile={hw_tile} must divide H*W={HW}")
    n_hw = HW // hw_tile

    grid_spec = pltpu.PrefetchScalarGridSpec(
        num_scalar_prefetch=0,
        grid=(n_hw,),                                                 # spatial reduction axis
        in_specs=[
            pl.BlockSpec((B, C, hw_tile), lambda i: (0, 0, i)),
            pl.BlockSpec((B, C, hw_tile), lambda i: (0, 0, i)),
            pl.BlockSpec((B, C, hw_tile), lambda i: (0, 0, i)),
            pl.BlockSpec((C, K), lambda i: (0, 0)),                   # resident across the grid
        ],
        out_specs=pl.BlockSpec((1, 1), lambda i: (0, 0)),             # written only at last step
        scratch_shapes=[pltpu.VMEM((B, C), jnp.float32),              # per-view spatial-sum accs
                        pltpu.VMEM((B, C), jnp.float32),
                        pltpu.VMEM((B, C), jnp.float32)],
    )

    kernel = functools.partial(mi_da_kernel, batch=B, inv_hw=1.0 / HW)
    out = pl.pallas_call(
        kernel,
        grid_spec=grid_spec,
        out_shape=jax.ShapeDtypeStruct((1, 1), jnp.float32),
        compiler_params=pltpu.CompilerParams(
            # The single grid axis is the reduction feeding shared accumulators + a finalize
            # step, so it must stay sequential ("arbitrary"); a parallel axis would split the
            # accumulators across TensorCores and drop partial sums.
            dimension_semantics=("arbitrary",),
            vmem_limit_bytes=32 * 1024 * 1024,
        ),
    )(xa, xb, xc, w_t)
    return out[0, 0]


def _forward_da_reference(a, b, c, conv_weight):
    """Pure-JAX reference of the PyTorch forward_da (backbone = identity)."""
    B = a.shape[0]
    K = conv_weight.shape[0]
    w = conv_weight.reshape(K, -1).astype(jnp.float32)

    def head(x):
        mean = jnp.mean(x.astype(jnp.float32).reshape(B, x.shape[1], -1), axis=-1)
        logits = jnp.dot(mean, w.T, precision=jax.lax.Precision.HIGHEST)
        return jax.nn.softmax(logits, axis=-1)

    def iic(z, zt, eps=1e-10):
        P = (z[:, :, None] * zt[:, None, :]).sum(0)
        P = (P + P.T) / 2.0 / P.sum()
        P = jnp.where(P < eps, eps, P)
        Pi = P.sum(1, keepdims=True)
        Pj = P.sum(0, keepdims=True)
        return (P * (jnp.log(Pi) + jnp.log(Pj) - jnp.log(P))).sum()

    za, zb, zc = head(a), head(b), head(c)
    return (iic(za, zb) + iic(zb, zc) + iic(zc, za)) / (3.0 * B)


if __name__ == "__main__":
    key = jax.random.PRNGKey(0)
    k_a, k_b, k_c, k_w = jax.random.split(key, 4)

    B, C_in, H, W = 2, 4, 16, 16
    K = 10  # nr_clusters

    a = jax.random.normal(k_a, (B, C_in, H, W), dtype=jnp.float32)
    b = jax.random.normal(k_b, (B, C_in, H, W), dtype=jnp.float32)
    c = jax.random.normal(k_c, (B, C_in, H, W), dtype=jnp.float32)

    # kaiming_normal_(mode='fan_in', nonlinearity='relu'): std = sqrt(2 / fan_in), fan_in = C_in.
    conv_weight = jax.random.normal(k_w, (K, C_in, 1, 1), dtype=jnp.float32) * jnp.sqrt(2.0 / C_in)

    # hw_tile=128 -> 2-step grid: exercises the init / accumulate / finalize pipeline at demo size.
    loss = forward_da(a, b, c, conv_weight, hw_tile=128)
    jax.block_until_ready(loss)

    ref = _forward_da_reference(a, b, c, conv_weight)
    if not jnp.allclose(loss, ref, rtol=5e-2, atol=1e-3):
        raise AssertionError(f"mismatch: kernel={float(loss)} ref={float(ref)}")
    print("KERNEL_OK")
</pallas_src>

<mosaic_0001>
module attributes {stable_mosaic.version = 11 : i64} {
  func.func @mi_da_kernel(%arg0: i32, %arg1: memref<2x4x128xf32, #tpu.memory_space<vmem>>, %arg2: memref<2x4x128xf32, #tpu.memory_space<vmem>>, %arg3: memref<2x4x128xf32, #tpu.memory_space<vmem>>, %arg4: memref<4x10xf32, #tpu.memory_space<vmem>>, %arg5: memref<1x1xf32, #tpu.memory_space<vmem>>, %arg6: memref<2x4xf32, #tpu.memory_space<vmem>>, %arg7: memref<2x4xf32, #tpu.memory_space<vmem>>, %arg8: memref<2x4xf32, #tpu.memory_space<vmem>>) attributes {dimension_semantics = [#tpu.dimension_semantics<arbitrary>], iteration_bounds = array<i64: 2>, scalar_prefetch = 0 : i64, scratch_operands = 3 : i64, tpu.core_type = #tpu.core_type<tc>, window_params = [{transform_indices = @transform_0, window_bounds = array<i64: 2, 4, 128>}, {transform_indices = @transform_1, window_bounds = array<i64: 2, 4, 128>}, {transform_indices = @transform_2, window_bounds = array<i64: 2, 4, 128>}, {pipeline_mode = #tpu.pipeline_mode<synchronous>, transform_indices = @transform_3, window_bounds = array<i64: 4, 10>}, {pipeline_mode = #tpu.pipeline_mode<synchronous>, transform_indices = @transform_4, window_bounds = array<i64: 1, 1>}]} {
    %c0_i32 = arith.constant 0 : i32
    %0 = arith.cmpi eq, %arg0, %c0_i32 : i32
    %1 = arith.extui %0 : i1 to i32
    %c0_i32_0 = arith.constant 0 : i32
    %2 = arith.cmpi ne, %1, %c0_i32_0 : i32
    scf.if %2 {
      %cst_24 = arith.constant 0.000000e+00 : f32
      %21 = vector.broadcast %cst_24 : f32 to vector<2x4xf32>
      %c0_25 = arith.constant 0 : index
      %c0_26 = arith.constant 0 : index
      %22 = vector.load %arg6[%c0_25, %c0_26] : memref<2x4xf32, #tpu.memory_space<vmem>>, vector<2x4xf32>
      tpu.vector_store %arg6[%c0_25, %c0_26], %21 {strides = array<i32>} : memref<2x4xf32, #tpu.memory_space<vmem>>, vector<2x4xf32>,
      %cst_27 = arith.constant 0.000000e+00 : f32
      %23 = vector.broadcast %cst_27 : f32 to vector<2x4xf32>
      %c0_28 = arith.constant 0 : index
      %c0_29 = arith.constant 0 : index
      %24 = vector.load %arg7[%c0_28, %c0_29] : memref<2x4xf32, #tpu.memory_space<vmem>>, vector<2x4xf32>
      tpu.vector_store %arg7[%c0_28, %c0_29], %23 {strides = array<i32>} : memref<2x4xf32, #tpu.memory_space<vmem>>, vector<2x4xf32>,
      %cst_30 = arith.constant 0.000000e+00 : f32
      %25 = vector.broadcast %cst_30 : f32 to vector<2x4xf32>
      %c0_31 = arith.constant 0 : index
      %c0_32 = arith.constant 0 : index
      %26 = vector.load %arg8[%c0_31, %c0_32] : memref<2x4xf32, #tpu.memory_space<vmem>>, vector<2x4xf32>
      tpu.vector_store %arg8[%c0_31, %c0_32], %25 {strides = array<i32>} : memref<2x4xf32, #tpu.memory_space<vmem>>, vector<2x4xf32>,
    } else {
    }
    %c0 = arith.constant 0 : index
    %c0_1 = arith.constant 0 : index
    %3 = vector.load %arg6[%c0, %c0_1] : memref<2x4xf32, #tpu.memory_space<vmem>>, vector<2x4xf32>
    %c0_2 = arith.constant 0 : index
    %c0_3 = arith.constant 0 : index
    %c0_4 = arith.constant 0 : index
    %4 = vector.load %arg1[%c0_2, %c0_3, %c0_4] : memref<2x4x128xf32, #tpu.memory_space<vmem>>, vector<2x4x128xf32>
    %cst = arith.constant dense<0.000000e+00> : vector<2x4xf32>
    %5 = vector.multi_reduction <add>, %4, %cst [2] : vector<2x4x128xf32> to vector<2x4xf32>
    %6 = arith.addf %3, %5 : vector<2x4xf32>
    %c0_5 = arith.constant 0 : index
    %c0_6 = arith.constant 0 : index
    %7 = vector.load %arg6[%c0_5, %c0_6] : memref<2x4xf32, #tpu.memory_space<vmem>>, vector<2x4xf32>
    tpu.vector_store %arg6[%c0_5, %c0_6], %6 {strides = array<i32>} : memref<2x4xf32, #tpu.memory_space<vmem>>, vector<2x4xf32>,
    %c0_7 = arith.constant 0 : index
    %c0_8 = arith.constant 0 : index
    %8 = vector.load %arg7[%c0_7, %c0_8] : memref<2x4xf32, #tpu.memory_space<vmem>>, vector<2x4xf32>
    %c0_9 = arith.constant 0 : index
    %c0_10 = arith.constant 0 : index
    %c0_11 = arith.constant 0 : index
    %9 = vector.load %arg2[%c0_9, %c0_10, %c0_11] : memref<2x4x128xf32, #tpu.memory_space<vmem>>, vector<2x4x128xf32>
    %cst_12 = arith.constant dense<0.000000e+00> : vector<2x4xf32>
    %10 = vector.multi_reduction <add>, %9, %cst_12 [2] : vector<2x4x128xf32> to vector<2x4xf32>
    %11 = arith.addf %8, %10 : vector<2x4xf32>
    %c0_13 = arith.constant 0 : index
    %c0_14 = arith.constant 0 : index
    %12 = vector.load %arg7[%c0_13, %c0_14] : memref<2x4xf32, #tpu.memory_space<vmem>>, vector<2x4xf32>
    tpu.vector_store %arg7[%c0_13, %c0_14], %11 {strides = array<i32>} : memref<2x4xf32, #tpu.memory_space<vmem>>, vector<2x4xf32>,
    %c0_15 = arith.constant 0 : index
    %c0_16 = arith.constant 0 : index
    %13 = vector.load %arg8[%c0_15, %c0_16] : memref<2x4xf32, #tpu.memory_space<vmem>>, vector<2x4xf32>
    %c0_17 = arith.constant 0 : index
    %c0_18 = arith.constant 0 : index
    %c0_19 = arith.constant 0 : index
    %14 = vector.load %arg3[%c0_17, %c0_18, %c0_19] : memref<2x4x128xf32, #tpu.memory_space<vmem>>, vector<2x4x128xf32>
    %cst_20 = arith.constant dense<0.000000e+00> : vector<2x4xf32>
    %15 = vector.multi_reduction <add>, %14, %cst_20 [2] : vector<2x4x128xf32> to vector<2x4xf32>
    %16 = arith.addf %13, %15 : vector<2x4xf32>
    %c0_21 = arith.constant 0 : index
    %c0_22 = arith.constant 0 : index
    %17 = vector.load %arg8[%c0_21, %c0_22] : memref<2x4xf32, #tpu.memory_space<vmem>>, vector<2x4xf32>
    tpu.vector_store %arg8[%c0_21, %c0_22], %16 {strides = array<i32>} : memref<2x4xf32, #tpu.memory_space<vmem>>, vector<2x4xf32>,
    %c1_i32 = arith.constant 1 : i32
    %18 = arith.cmpi eq, %arg0, %c1_i32 : i32
    %19 = arith.extui %18 : i1 to i32
    %c0_i32_23 = arith.constant 0 : i32
    %20 = arith.cmpi ne, %19, %c0_i32_23 : i32
    scf.if %20 {
      %c0_24 = arith.constant 0 : index
      %c0_25 = arith.constant 0 : index
      %21 = vector.load %arg4[%c0_24, %c0_25] : memref<4x10xf32, #tpu.memory_space<vmem>>, vector<4x10xf32>
      %c0_26 = arith.constant 0 : index
      %c0_27 = arith.constant 0 : index
      %22 = vector.load %arg6[%c0_26, %c0_27] : memref<2x4xf32, #tpu.memory_space<vmem>>, vector<2x4xf32>
      %cst_28 = arith.constant 3.906250e-03 : f32
      %23 = vector.broadcast %cst_28 : f32 to vector<2x4xf32>
      %24 = arith.mulf %22, %23 : vector<2x4xf32>
      %cst_29 = arith.constant dense<0.000000e+00> : vector<2x10xf32>
      %25 = tpu.matmul %24, %21, %cst_29 {dimension_numbers = #tpu.dot_dimension_numbers<[1], [0], [0], [1], [0, 0, 1, 1], [], []>} : vector<2x4xf32>, vector<4x10xf32>, vector<2x10xf32> -> vector<2x10xf32>
      %cst_30 = arith.constant dense<0xFF800000> : vector<2xf32>
      %26 = vector.multi_reduction <maximumf>, %25, %cst_30 [1] : vector<2x10xf32> to vector<2xf32>
      %27 = vector.shape_cast %26 : vector<2xf32> to vector<2x1xf32>
      %28 = vector.broadcast %27 : vector<2x1xf32> to vector<2x10xf32>
      %29 = arith.subf %25, %28 : vector<2x10xf32>
      %30 = math.exp %29 : vector<2x10xf32>
      %cst_31 = arith.constant dense<0.000000e+00> : vector<2xf32>
      %31 = vector.multi_reduction <add>, %30, %cst_31 [1] : vector<2x10xf32> to vector<2xf32>
      %32 = vector.shape_cast %31 : vector<2xf32> to vector<2x1xf32>
      %33 = vector.broadcast %32 : vector<2x1xf32> to vector<2x10xf32>
      %34 = arith.divf %30, %33 : vector<2x10xf32>
      %c0_32 = arith.constant 0 : index
      %c0_33 = arith.constant 0 : index
      %35 = vector.load %arg7[%c0_32, %c0_33] : memref<2x4xf32, #tpu.memory_space<vmem>>, vector<2x4xf32>
      %cst_34 = arith.constant 3.906250e-03 : f32
      %36 = vector.broadcast %cst_34 : f32 to vector<2x4xf32>
      %37 = arith.mulf %35, %36 : vector<2x4xf32>
      %cst_35 = arith.constant dense<0.000000e+00> : vector<2x10xf32>
      %38 = tpu.matmul %37, %21, %cst_35 {dimension_numbers = #tpu.dot_dimension_numbers<[1], [0], [0], [1], [0, 0, 1, 1], [], []>} : vector<2x4xf32>, vector<4x10xf32>, vector<2x10xf32> -> vector<2x10xf32>
      %cst_36 = arith.constant dense<0xFF800000> : vector<2xf32>
      %39 = vector.multi_reduction <maximumf>, %38, %cst_36 [1] : vector<2x10xf32> to vector<2xf32>
      %40 = vector.shape_cast %39 : vector<2xf32> to vector<2x1xf32>
      %41 = vector.broadcast %40 : vector<2x1xf32> to vector<2x10xf32>
      %42 = arith.subf %38, %41 : vector<2x10xf32>
      %43 = math.exp %42 : vector<2x10xf32>
      %cst_37 = arith.constant dense<0.000000e+00> : vector<2xf32>
      %44 = vector.multi_reduction <add>, %43, %cst_37 [1] : vector<2x10xf32> to vector<2xf32>
      %45 = vector.shape_cast %44 : vector<2xf32> to vector<2x1xf32>
      %46 = vector.broadcast %45 : vector<2x1xf32> to vector<2x10xf32>
      %47 = arith.divf %43, %46 : vector<2x10xf32>
      %c0_38 = arith.constant 0 : index
      %c0_39 = arith.constant 0 : index
      %48 = vector.load %arg8[%c0_38, %c0_39] : memref<2x4xf32, #tpu.memory_space<vmem>>, vector<2x4xf32>
      %cst_40 = arith.constant 3.906250e-03 : f32
      %49 = vector.broadcast %cst_40 : f32 to vector<2x4xf32>
      %50 = arith.mulf %48, %49 : vector<2x4xf32>
      %cst_41 = arith.constant dense<0.000000e+00> : vector<2x10xf32>
      %51 = tpu.matmul %50, %21, %cst_41 {dimension_numbers = #tpu.dot_dimension_numbers<[1], [0], [0], [1], [0, 0, 1, 1], [], []>} : vector<2x4xf32>, vector<4x10xf32>, vector<2x10xf32> -> vector<2x10xf32>
      %cst_42 = arith.constant dense<0xFF800000> : vector<2xf32>
      %52 = vector.multi_reduction <maximumf>, %51, %cst_42 [1] : vector<2x10xf32> to vector<2xf32>
      %53 = vector.shape_cast %52 : vector<2xf32> to vector<2x1xf32>
      %54 = vector.broadcast %53 : vector<2x1xf32> to vector<2x10xf32>
      %55 = arith.subf %51, %54 : vector<2x10xf32>
      %56 = math.exp %55 : vector<2x10xf32>
      %cst_43 = arith.constant dense<0.000000e+00> : vector<2xf32>
      %57 = vector.multi_reduction <add>, %56, %cst_43 [1] : vector<2x10xf32> to vector<2xf32>
      %58 = vector.shape_cast %57 : vector<2xf32> to vector<2x1xf32>
      %59 = vector.broadcast %58 : vector<2x1xf32> to vector<2x10xf32>
      %60 = arith.divf %56, %59 : vector<2x10xf32>
      %cst_44 = arith.constant dense<0.000000e+00> : vector<10x10xf32>
      %61 = tpu.matmul %34, %47, %cst_44 {dimension_numbers = #tpu.dot_dimension_numbers<[0], [0], [1], [1], [0, 1, 1, 1], [], []>} : vector<2x10xf32>, vector<2x10xf32>, vector<10x10xf32> -> vector<10x10xf32>
      %cst_45 = arith.constant dense<0.000000e+00> : vector<10x10xf32>
      %62 = tpu.matmul %47, %34, %cst_45 {dimension_numbers = #tpu.dot_dimension_numbers<[0], [0], [1], [1], [0, 1, 1, 1], [], []>} : vector<2x10xf32>, vector<2x10xf32>, vector<10x10xf32> -> vector<10x10xf32>
      %63 = vector.shape_cast %61 : vector<10x10xf32> to vector<1x10x10xf32>
      %cst_46 = arith.constant dense<0.000000e+00> : vector<1xf32>
      %64 = vector.multi_reduction <add>, %63, %cst_46 [1, 2] : vector<1x10x10xf32> to vector<1xf32>
      %65 = vector.shape_cast %64 : vector<1xf32> to vector<1x1x1xf32>
      %66 = vector.extract %65[0, 0, 0] : f32 from vector<1x1x1xf32>
      %67 = vector.broadcast %66 : f32 to vector<1x1xf32>
      %68 = arith.addf %61, %62 : vector<10x10xf32>
      %cst_47 = arith.constant 5.000000e-01 : f32
      %69 = vector.broadcast %cst_47 : f32 to vector<10x10xf32>
      %70 = arith.mulf %68, %69 : vector<10x10xf32>
      %71 = vector.broadcast %67 : vector<1x1xf32> to vector<10x10xf32>
      %72 = arith.divf %70, %71 : vector<10x10xf32>
      %cst_48 = arith.constant 1.000000e-10 : f32
      %73 = vector.broadcast %cst_48 : f32 to vector<10x10xf32>
      %74 = arith.maximumf %72, %73 : vector<10x10xf32>
      %cst_49 = arith.constant dense<0.000000e+00> : vector<10xf32>
      %75 = vector.multi_reduction <add>, %74, %cst_49 [1] : vector<10x10xf32> to vector<10xf32>
      %76 = vector.shape_cast %75 : vector<10xf32> to vector<10x1xf32>
      %cst_50 = arith.constant dense<0.000000e+00> : vector<10xf32>
      %77 = vector.multi_reduction <add>, %74, %cst_50 [0] : vector<10x10xf32> to vector<10xf32>
      %78 = vector.shape_cast %77 : vector<10xf32> to vector<1x10xf32>
      %79 = math.log %76 : vector<10x1xf32>
      %80 = math.log %78 : vector<1x10xf32>
      %81 = vector.broadcast %79 : vector<10x1xf32> to vector<10x10xf32>
      %82 = vector.broadcast %80 : vector<1x10xf32> to vector<10x10xf32>
      %83 = arith.addf %81, %82 : vector<10x10xf32>
      %84 = math.log %74 : vector<10x10xf32>
      %85 = arith.subf %83, %84 : vector<10x10xf32>
      %86 = arith.mulf %74, %85 : vector<10x10xf32>
      %87 = vector.shape_cast %86 : vector<10x10xf32> to vector<1x10x10xf32>
      %cst_51 = arith.constant dense<0.000000e+00> : vector<1xf32>
      %88 = vector.multi_reduction <add>, %87, %cst_51 [1, 2] : vector<1x10x10xf32> to vector<1xf32>
      %89 = vector.shape_cast %88 : vector<1xf32> to vector<1x1x1xf32>
      %90 = vector.extract %89[0, 0, 0] : f32 from vector<1x1x1xf32>
      %91 = vector.broadcast %90 : f32 to vector<1x1xf32>
      %cst_52 = arith.constant dense<0.000000e+00> : vector<10x10xf32>
      %92 = tpu.matmul %47, %60, %cst_52 {dimension_numbers = #tpu.dot_dimension_numbers<[0], [0], [1], [1], [0, 1, 1, 1], [], []>} : vector<2x10xf32>, vector<2x10xf32>, vector<10x10xf32> -> vector<10x10xf32>
      %cst_53 = arith.constant dense<0.000000e+00> : vector<10x10xf32>
      %93 = tpu.matmul %60, %47, %cst_53 {dimension_numbers = #tpu.dot_dimension_numbers<[0], [0], [1], [1], [0, 1, 1, 1], [], []>} : vector<2x10xf32>, vector<2x10xf32>, vector<10x10xf32> -> vector<10x10xf32>
      %94 = vector.shape_cast %92 : vector<10x10xf32> to vector<1x10x10xf32>
      %cst_54 = arith.constant dense<0.000000e+00> : vector<1xf32>
      %95 = vector.multi_reduction <add>, %94, %cst_54 [1, 2] : vector<1x10x10xf32> to vector<1xf32>
      %96 = vector.shape_cast %95 : vector<1xf32> to vector<1x1x1xf32>
      %97 = vector.extract %96[0, 0, 0] : f32 from vector<1x1x1xf32>
      %98 = vector.broadcast %97 : f32 to vector<1x1xf32>
      %99 = arith.addf %92, %93 : vector<10x10xf32>
      %cst_55 = arith.constant 5.000000e-01 : f32
      %100 = vector.broadcast %cst_55 : f32 to vector<10x10xf32>
      %101 = arith.mulf %99, %100 : vector<10x10xf32>
      %102 = vector.broadcast %98 : vector<1x1xf32> to vector<10x10xf32>
      %103 = arith.divf %101, %102 : vector<10x10xf32>
      %cst_56 = arith.constant 1.000000e-10 : f32
      %104 = vector.broadcast %cst_56 : f32 to vector<10x10xf32>
      %105 = arith.maximumf %103, %104 : vector<10x10xf32>
      %cst_57 = arith.constant dense<0.000000e+00> : vector<10xf32>
      %106 = vector.multi_reduction <add>, %105, %cst_57 [1] : vector<10x10xf32> to vector<10xf32>
      %107 = vector.shape_cast %106 : vector<10xf32> to vector<10x1xf32>
      %cst_58 = arith.constant dense<0.000000e+00> : vector<10xf32>
      %108 = vector.multi_reduction <add>, %105, %cst_58 [0] : vector<10x10xf32> to vector<10xf32>
      %109 = vector.shape_cast %108 : vector<10xf32> to vector<1x10xf32>
      %110 = math.log %107 : vector<10x1xf32>
      %111 = math.log %109 : vector<1x10xf32>
      %112 = vector.broadcast %110 : vector<10x1xf32> to vector<10x10xf32>
      %113 = vector.broadcast %111 : vector<1x10xf32> to vector<10x10xf32>
      %114 = arith.addf %112, %113 : vector<10x10xf32>
      %115 = math.log %105 : vector<10x10xf32>
      %116 = arith.subf %114, %115 : vector<10x10xf32>
      %117 = arith.mulf %105, %116 : vector<10x10xf32>
      %118 = vector.shape_cast %117 : vector<10x10xf32> to vector<1x10x10xf32>
      %cst_59 = arith.constant dense<0.000000e+00> : vector<1xf32>
      %119 = vector.multi_reduction <add>, %118, %cst_59 [1, 2] : vector<1x10x10xf32> to vector<1xf32>
      %120 = vector.shape_cast %119 : vector<1xf32> to vector<1x1x1xf32>
      %121 = vector.extract %120[0, 0, 0] : f32 from vector<1x1x1xf32>
      %122 = vector.broadcast %121 : f32 to vector<1x1xf32>
      %123 = arith.addf %91, %122 : vector<1x1xf32>
      %cst_60 = arith.constant dense<0.000000e+00> : vector<10x10xf32>
      %124 = tpu.matmul %60, %34, %cst_60 {dimension_numbers = #tpu.dot_dimension_numbers<[0], [0], [1], [1], [0, 1, 1, 1], [], []>} : vector<2x10xf32>, vector<2x10xf32>, vector<10x10xf32> -> vector<10x10xf32>
      %cst_61 = arith.constant dense<0.000000e+00> : vector<10x10xf32>
      %125 = tpu.matmul %34, %60, %cst_61 {dimension_numbers = #tpu.dot_dimension_numbers<[0], [0], [1], [1], [0, 1, 1, 1], [], []>} : vector<2x10xf32>, vector<2x10xf32>, vector<10x10xf32> -> vector<10x10xf32>
      %126 = vector.shape_cast %124 : vector<10x10xf32> to vector<1x10x10xf32>
      %cst_62 = arith.constant dense<0.000000e+00> : vector<1xf32>
      %127 = vector.multi_reduction <add>, %126, %cst_62 [1, 2] : vector<1x10x10xf32> to vector<1xf32>
      %128 = vector.shape_cast %127 : vector<1xf32> to vector<1x1x1xf32>
      %129 = vector.extract %128[0, 0, 0] : f32 from vector<1x1x1xf32>
      %130 = vector.broadcast %129 : f32 to vector<1x1xf32>
      %131 = arith.addf %124, %125 : vector<10x10xf32>
      %cst_63 = arith.constant 5.000000e-01 : f32
      %132 = vector.broadcast %cst_63 : f32 to vector<10x10xf32>
      %133 = arith.mulf %131, %132 : vector<10x10xf32>
      %134 = vector.broadcast %130 : vector<1x1xf32> to vector<10x10xf32>
      %135 = arith.divf %133, %134 : vector<10x10xf32>
      %cst_64 = arith.constant 1.000000e-10 : f32
      %136 = vector.broadcast %cst_64 : f32 to vector<10x10xf32>
      %137 = arith.maximumf %135, %136 : vector<10x10xf32>
      %cst_65 = arith.constant dense<0.000000e+00> : vector<10xf32>
      %138 = vector.multi_reduction <add>, %137, %cst_65 [1] : vector<10x10xf32> to vector<10xf32>
      %139 = vector.shape_cast %138 : vector<10xf32> to vector<10x1xf32>
      %cst_66 = arith.constant dense<0.000000e+00> : vector<10xf32>
      %140 = vector.multi_reduction <add>, %137, %cst_66 [0] : vector<10x10xf32> to vector<10xf32>
      %141 = vector.shape_cast %140 : vector<10xf32> to vector<1x10xf32>
      %142 = math.log %139 : vector<10x1xf32>
      %143 = math.log %141 : vector<1x10xf32>
      %144 = vector.broadcast %142 : vector<10x1xf32> to vector<10x10xf32>
      %145 = vector.broadcast %143 : vector<1x10xf32> to vector<10x10xf32>
      %146 = arith.addf %144, %145 : vector<10x10xf32>
      %147 = math.log %137 : vector<10x10xf32>
      %148 = arith.subf %146, %147 : vector<10x10xf32>
      %149 = arith.mulf %137, %148 : vector<10x10xf32>
      %150 = vector.shape_cast %149 : vector<10x10xf32> to vector<1x10x10xf32>
      %cst_67 = arith.constant dense<0.000000e+00> : vector<1xf32>
      %151 = vector.multi_reduction <add>, %150, %cst_67 [1, 2] : vector<1x10x10xf32> to vector<1xf32>
      %152 = vector.shape_cast %151 : vector<1xf32> to vector<1x1x1xf32>
      %153 = vector.extract %152[0, 0, 0] : f32 from vector<1x1x1xf32>
      %154 = vector.broadcast %153 : f32 to vector<1x1xf32>
      %155 = arith.addf %123, %154 : vector<1x1xf32>
      %cst_68 = arith.constant 0.166666672 : f32
      %156 = vector.broadcast %cst_68 : f32 to vector<1x1xf32>
      %157 = arith.mulf %155, %156 : vector<1x1xf32>
      %c0_69 = arith.constant 0 : index
      %c0_70 = arith.constant 0 : index
      %158 = vector.load %arg5[%c0_69, %c0_70] : memref<1x1xf32, #tpu.memory_space<vmem>>, vector<1x1xf32>
      tpu.vector_store %arg5[%c0_69, %c0_70], %157 {strides = array<i32>} : memref<1x1xf32, #tpu.memory_space<vmem>>, vector<1x1xf32>,
    } else {
    }
    return
  }
  func.func @transform_0(%arg0: i32) -> (i32, i32, i32) {
    %c0_i32 = arith.constant 0 : i32
    %c0_i32_0 = arith.constant 0 : i32
    %c0_i32_1 = arith.constant 0 : i32
    return %c0_i32, %c0_i32_0, %arg0 : i32, i32, i32
  }
  func.func @transform_1(%arg0: i32) -> (i32, i32, i32) {
    %c0_i32 = arith.constant 0 : i32
    %c0_i32_0 = arith.constant 0 : i32
    %c0_i32_1 = arith.constant 0 : i32
    return %c0_i32, %c0_i32_0, %arg0 : i32, i32, i32
  }
  func.func @transform_2(%arg0: i32) -> (i32, i32, i32) {
    %c0_i32 = arith.constant 0 : i32
    %c0_i32_0 = arith.constant 0 : i32
    %c0_i32_1 = arith.constant 0 : i32
    return %c0_i32, %c0_i32_0, %arg0 : i32, i32, i32
  }
  func.func @transform_3(%arg0: i32) -> (i32, i32) {
    %c0_i32 = arith.constant 0 : i32
    %c0_i32_0 = arith.constant 0 : i32
    %c0_i32_1 = arith.constant 0 : i32
    return %c0_i32, %c0_i32_0 : i32, i32
  }
  func.func @transform_4(%arg0: i32) -> (i32, i32) {
    %c0_i32 = arith.constant 0 : i32
    %c0_i32_0 = arith.constant 0 : i32
    %c0_i32_1 = arith.constant 0 : i32
    return %c0_i32, %c0_i32_0 : i32, i32
  }
}

</mosaic_0001>

<bundles_post_ra>
// kernel: tpu_custom_call.1
= control target key start
LH: loop header
LB: loop body
LE: loop exit
PB: predicated region body
PF: predicated region fallthrough
CT: control target
= control target key end

     0   :  { %9 = vsyncpa [#allocation6], 0  ;;  %s2198_s0 = inlined_call_operand.hbm [shape: f32[2,4,256], index: 0, kind: input, shape index: {}]   ;;  %s2199_s1 = inlined_call_operand.hbm [shape: f32[2,4,256], index: 1, kind: input, shape index: {}]   ;;  %s2200_s2 = inlined_call_operand.hbm [shape: f32[2,4,256], index: 2, kind: input, shape index: {}]   ;;  %s2201_s3 = inlined_call_operand.vmem [shape: f32[4,10], index: 3, kind: input, shape index: {}]   ;;  %s2202_s4 = inlined_call_operand.hbm [shape: f32[1,1], index: 4, kind: output, shape index: {}]  }
   0x1   :  { %11 = vsyncpa [#allocation6 + $0x1], 0 }
   0x2   :  { %12 = vsyncpa [#allocation9], 0 }
   0x3   :  { %14 = vsyncpa [#allocation9 + $0x1], 0 }
   0x4   :  { %15 = vsyncpa [#allocation7], 0  ;;  %s1922_s15 = smov 0   ;;  %s1924_s16 = smov 0  }
   0x5   :  { %s1926_s17 = smov 0   ;;  %s1928_s18 = smov 0  }
   0x6 LB: > { %s1941_s19 = sadd.s32 4294967295, %s1885_s18   ;;  %s1944_s20 = sadd.s32 1, %s1885_s18   ;;  %s1885_s18 = sphi %s1928_s18, %s2214_s18   ;;  %s1881_s17 = sphi %s1926_s17, %s2213_s17   ;;  %s1877_s16 = sphi %s1924_s16, %s2212_s16   ;;  %s1873_s15 = sphi %s1922_s15, %s2211_s15  }
   0x7   : > { %s25_s21 = ssub.s32 %s1885_s18, %s1944_s20  ;;  %s28_s22 = sadd.s32 1, %s1881_s17 }
   0x8   : > { %p26_p0 = scmp.eq.s32.totalorder %s25_s21, 0  ;;  %p35_p1 = scmp.ne.s32.totalorder %s1881_s17, %s1877_s16 }
   0x9   : > { %p36_p2 = scmp.eq.s32.totalorder %s1885_s18, 0  ;;  %p41_p3 = scmp.ne.s32.totalorder %s1877_s16, %s1873_s15 }
   0xa   : > { %s1954_s23 = scalar_select %p26_p0, %s1881_s17, %s28_s22  }
   0xb   : > { %p37_p4 = por %p36_p2, %p35_p1  ;;  %p42_p5 = scmp.eq.s32.totalorder %s1941_s19, 0 }
   0xc   : > { %p1645_p6 = scmp.lt.s32.totalorder %s1885_s18, 2  ;;  %s162_s25 = sand.u32 1, %s1881_s17  }
   0xd   : > { %p1958_p7 = por %p42_p5, %p41_p3  ;;  %s1965_s26 = sshll.u32 %s162_s25, 3 }
   0xe   : > { %s1968_s27 = sshll.u32 %s1885_s18, 6  ;;  %p1970_p8 = pnand %p1645_p6, %p37_p4 }
   0xf   : > { %s2204_s24 = scalar_select %p1958_p7, 1, 0 }
  0x10   : > { %s182_s29 = sand.u32 1, %s1885_s18   ;;  %s1979_s6 = scalar_lea.hbm %s2199_s1, %s1968_s27 }
  0x11   : > { %s186_s7 = scalar_lea.vmem [#allocation8], %s1965_s26  ;;  %s1985_s9 = scalar_lea.sflag [#allocation9], %s182_s29 }
  0x12   : > { %s192_s8 = sshll.u32 %s186_s7, 4  ;;  %s1735_s10 = scalar_lea.hbm %s1979_s6, 128  ;;  %s1982_s8 = int_to_ptr.vmem [resolvable:$true] %s192_s8 }
  0x13   : > { %p1736_p10 = scmp.ne.s32.totalorder %s1979_s6, %s1735_s10  ;;  %p1991_p11 = pneg %p1970_p8 }
  0x14   : > { %s1740_s14 = scalar_lea.hbm %s2199_s1, 256  ;;  %p1741_p0 = scmp.lt.s32.totalorder %s1979_s6, %s2199_s1 }
  0x15   : > { %p1738_p12 = pnand %p1991_p11, %p1736_p10  ;;  %p1742_p1 = scmp.lt.s32.totalorder %s1740_s14, %s1735_s10 }
  0x17   : > { %p1739_p13 = pneg %p1738_p12  ;;  %p1743_p2 = por %p1742_p1, %p1741_p0 }
  0x19   : > { %p1744_p3 = pnand %p1743_p2, %p1739_p13 }
  0x1b   : > { %1747 = shalt.err (!%p1744_p3)
}
  0x1c   : > { %s1748_s22 = scalar_lea.vmem %s1982_s8, 128  ;;  %s1887_s29 = smov [#allocation8]  }
  0x1d   : > { %p1749_p4 = scmp.ne.s32.totalorder %s1982_s8, %s1748_s22  ;;  %s1753_s30 = sshll.u32 %s1887_s29, 4  ;;  %s1754_s30 = int_to_ptr.vmem [resolvable:$false] %s1753_s30 }
  0x1e   : > { %s1755_s5 = scalar_lea.vmem %s1754_s30, 256  ;;  %p1756_p10 = scmp.lt.s32.totalorder %s1982_s8, %s1754_s30 }
  0x1f   : > { %p1751_p5 = pnand %p1749_p4, %p1991_p11  ;;  %p1757_p12 = scmp.lt.s32.totalorder %s1755_s5, %s1748_s22 }
  0x21   : > { %p1752_p6 = pneg %p1751_p5  ;;  %p1758_p9 = por %p1757_p12, %p1756_p10 }
  0x23   : > { %p1759_p7 = pnand %p1758_p9, %p1752_p6 }
  0x25   : > { %1762 = shalt.err (!%p1759_p7)
}
  0x26   : > { %s1888_s7 = smov 128   ;;  %s1889_s10 = smov 64  }
  0x27   : > { %s1890_s12 = smov 4   ;;  %p220_p9 = scmp.lt.s32.totalorder %s1885_s18, 3 }
  0x28   : > { %1641 = dma.hbm_to_vmem [thread:$0]  (!%p1970_p8), %s1979_s6, 128, %s1982_s8, %s1985_s9, %s1888_s7, %s1889_s10, %s1890_s12  }
  0x29   : > { %s2022_s15 = scalar_lea.hbm %s2198_s0, %s1968_s27  ;;  %p2207_p7 = scmp.ge.s32.totalorder %s1885_s18, 1 }
  0x2a   : > { %s166_s22 = scalar_lea.vmem [#allocation5], %s1965_s26  ;;  %s163_s6 = scalar_lea.sflag [#allocation6], %s162_s25 }
  0x2b   : > { %p2026_p13 = pnand %p2207_p7, %p220_p9  ;;  %s172_s29 = sshll.u32 %s166_s22, 4  ;;  %s2031_s29 = int_to_ptr.vmem [resolvable:$true] %s172_s29 }
  0x2c   : > { %s1763_s8 = scalar_lea.hbm %s2022_s15, 128  ;;  %s1768_s5 = scalar_lea.hbm %s2198_s0, 256 }
  0x2d   : > { %s2208_s21 = scalar_select %p2026_p13, 1, 0 }
  0x2e   : > { %p1764_p0 = scmp.ne.s32.totalorder %s2022_s15, %s1763_s8  ;;  %p1769_p3 = scmp.lt.s32.totalorder %s2022_s15, %s2198_s0 }
  0x2f   : > { %p1770_p4 = scmp.lt.s32.totalorder %s1768_s5, %s1763_s8 }
  0x30   : > { %p1766_p1 = pnand %p1764_p0, %p1991_p11 }
  0x31   : > { %p1771_p5 = por %p1770_p4, %p1769_p3 }
  0x32   : > { %p1767_p2 = pneg %p1766_p1 }
  0x34   : > { %p1772_p6 = pnand %p1771_p5, %p1767_p2 }
  0x36   : > { %1775 = shalt.err (!%p1772_p6)
}
  0x37   : > { %s1776_s25 = scalar_lea.vmem %s2031_s29, 128  ;;  %s1891_s22 = smov [#allocation5]  }
  0x38   : > { %p1777_p10 = scmp.ne.s32.totalorder %s2031_s29, %s1776_s25  ;;  %s1781_s30 = sshll.u32 %s1891_s22, 4  ;;  %s1782_s30 = int_to_ptr.vmem [resolvable:$false] %s1781_s30 }
  0x39   : > { %s1783_s18 = scalar_lea.vmem %s1782_s30, 256  ;;  %p1784_p7 = scmp.lt.s32.totalorder %s2031_s29, %s1782_s30 }
  0x3a   : > { %p1779_p12 = pnand %p1777_p10, %p1991_p11  ;;  %p1785_p0 = scmp.lt.s32.totalorder %s1783_s18, %s1776_s25 }
  0x3c   : > { %p1780_p9 = pneg %p1779_p12  ;;  %p1786_p1 = por %p1785_p0, %p1784_p7 }
  0x3e   : > { %p1787_p13 = pnand %p1786_p1, %p1780_p9 }
  0x40   : > { %1790 = shalt.err (!%p1787_p13)
}
  0x41   : > { %1638 = dma.hbm_to_vmem [thread:$0]  (!%p1970_p8), %s2022_s15, 128, %s2031_s29, %s163_s6, %s1888_s7, %s1889_s10, %s1890_s12  }
  0x42   : > { %s2062_s13 = scalar_lea.hbm %s2200_s2, %s1968_s27  ;;  %s206_s14 = scalar_lea.vmem [#allocation10], %s1965_s26 }
  0x43   : > { %s212_s25 = sshll.u32 %s206_s14, 4  ;;  %s1791_s22 = scalar_lea.hbm %s2062_s13, 128  ;;  %s213_s25 = int_to_ptr.vmem [resolvable:$true] %s212_s25 }
  0x44   : > { %p1792_p13 = scmp.ne.s32.totalorder %s2062_s13, %s1791_s22  ;;  %s1796_s15 = scalar_lea.hbm %s2200_s2, 256 }
  0x45   : > { %p1797_p4 = scmp.lt.s32.totalorder %s2062_s13, %s2200_s2  ;;  %p1798_p5 = scmp.lt.s32.totalorder %s1796_s15, %s1791_s22 }
  0x46   : > { %p1794_p2 = pnand %p1792_p13, %p1991_p11 }
  0x47   : > { %p1799_p6 = por %p1798_p5, %p1797_p4 }
  0x48   : > { %p1795_p3 = pneg %p1794_p2 }
  0x4a   : > { %p1800_p10 = pnand %p1799_p6, %p1795_p3 }
  0x4c   : > { %1803 = shalt.err (!%p1800_p10)
}
  0x4d   : > { %s1804_s26 = scalar_lea.vmem %s213_s25, 128  ;;  %s1892_s27 = smov [#allocation10]  }
  0x4e   : > { %p1805_p12 = scmp.ne.s32.totalorder %s213_s25, %s1804_s26  ;;  %s1809_s8 = sshll.u32 %s1892_s27, 4  ;;  %s1810_s8 = int_to_ptr.vmem [resolvable:$false] %s1809_s8 }
  0x4f   : > { %s1811_s5 = scalar_lea.vmem %s1810_s8, 256  ;;  %p1812_p0 = scmp.lt.s32.totalorder %s213_s25, %s1810_s8 }
  0x50   : > { %p1807_p9 = pnand %p1805_p12, %p1991_p11  ;;  %p1813_p1 = scmp.lt.s32.totalorder %s1811_s5, %s1804_s26 }
  0x52   : > { %p1808_p7 = pneg %p1807_p9  ;;  %p1814_p13 = por %p1813_p1, %p1812_p0 }
  0x54   : > { %p1815_p2 = pnand %p1814_p13, %p1808_p7 }
  0x56   : > { %1818 = shalt.err (!%p1815_p2)
}
  0x57   : > { %1644 = dma.hbm_to_vmem [thread:$0]  (!%p1970_p8), %s2062_s13, 128, %s213_s25, %s1985_s9, %s1888_s7, %s1889_s10, %s1890_s12  }
  0x58   : > { %p2209_p11 = scmp.ne.s32.totalorder %s2208_s21, 0 }
  0x59   : > { %s226_s11 = sand.u32 (!%p2209_p11), 1, %s1877_s16   ;;  %p2210_p3 = scmp.ne.s32.totalorder (!%p2209_p11), %s2204_s24, 0 }
  0x5a   : > { %224 = sbr.rel (%p2209_p11) target bundleno = 2490 (0x9ba), region = 36  ;;  %s2088_s14 = sshll.u32 (!%p2209_p11), %s226_s11, 3 }
  0x5b   : > { %s227_s22 = scalar_lea.sflag (!%p2209_p11), [#allocation6], %s226_s11  ;;  %s230_s30 = scalar_lea.vmem (!%p2209_p11), [#allocation5], %s2088_s14 }
  0x5f   : > { %1860 = dma.done.wait (%p2210_p3), %s227_s22, 128  }
  0x60   : > { %1862 = vsyncadd (%p2210_p3), %s227_s22, 4294967168  ;;  %s235_s28 = sand.u32 1, %s1941_s19   ;;  %s239_s7 = scalar_lea.vmem [#allocation8], %s2088_s14 }
  0x61   : > { %s236_s9 = scalar_lea.sflag [#allocation9], %s235_s28 }
  0x62   : > { %1864 = dma.done.wait (%p2210_p3), %s236_s9, 256  }
  0x63   : > { %1866 = vsyncadd (%p2210_p3), %s236_s9, 4294967040  ;;  %s248_s10 = scalar_lea.vmem [#allocation10], %s2088_s14  ;;  %p1514_p8 = scmp.ne.s32.totalorder %s1941_s19, 0 }
  0x65   : > { %281 = sbr.rel (%p1514_p8) target bundleno = 109 (0x6d), region = 52 }
  0x6a   : > { %vm282_vm0 = vcmask 25600   ;;  %v1893_v0 = vmov 0.0  }
  0x6b   : > { %283 = vst.msk [vmem:[#allocation2] sm:$0x3] %vm282_vm0, %v1893_v0  ;;  %284 = vst.msk [vmem:[#allocation3] sm:$0x3] %vm282_vm0, %v1893_v0 }
  0x6c   : > { %285 = vst.msk [vmem:[#allocation4] sm:$0x3] %vm282_vm0, %v1893_v0 }
  0x6d PF: > { %vm289_vm1 = vcmask 1043456   ;;  %v315_v1 = vld [vmem:[%s239_s7] sm:$0xf]  ;;  %v287_v2 = vld [vmem:[%s230_s30] sm:$0xf]  ;;  %v298_v13 = vlaneseq  ;;  %vm308_vm2 = vcmask 1041409  }
  0x6e   : > { %v317_v3 = vsel %vm289_vm1, %v315_v1, 0.0  ;;  %v290_v4 = vsel %vm289_vm1, %v287_v2, 0.0  ;;  %v316_v5 = vld [vmem:[%s239_s7 + $0x4] sm:$0xf]  ;;  %v288_v6 = vld [vmem:[%s230_s30 + $0x4] sm:$0xf] }
  0x6f   : > { %318 = vadd.xlane.f32.xlu1 %v317_v3  ;;  %291 = vadd.xlane.f32.xlu0 %v290_v4  ;;  %v320_v7 = vsel %vm289_vm1, %v316_v5, 0.0  ;;  %v293_v8 = vsel %vm289_vm1, %v288_v6, 0.0  ;;  %v339_v9 = vld [vmem:[%s248_s10 + $0x4] sm:$0xf]  ;;  %v338_v10 = vld [vmem:[%s248_s10] sm:$0xf] }
  0x70   : > { %v343_v11 = vsel %vm289_vm1, %v339_v9, 0.0  ;;  %v340_v12 = vsel %vm289_vm1, %v338_v10, 0.0  ;;  %v299_v14 = vand.u32 127, %v298_v13  ;;  %v301_v15 = vshrl.u32 %v298_v13, 7  ;;  %p1515_p4 = scmp.ne.s32.totalorder %s1941_s19, 1 }
  0x71   : > { %vm312_vm3 = vcmask 25600  }
  0x72   : > { %v302_v18 = vsub.s32 %v299_v14, %v301_v15  ;;  %v314_v23 = vld [vmem:[#allocation3] sm:$0x3]  ;;  %v286_v25 = vld [vmem:[#allocation2] sm:$0x3] }
  0x73   : > { %321 = vadd.xlane.f32.xlu1 %v320_v7  ;;  %294 = vadd.xlane.f32.xlu0 %v293_v8  ;;  %v337_v34 = vld [vmem:[#allocation4] sm:$0x3] }
  0x77   : > { %344 = vadd.xlane.f32.xlu1 %v343_v11  ;;  %341 = vadd.xlane.f32.xlu0 %v340_v12 }
  0xf8   : > { %v319_v16 = vpop.xlane.xlu1 %318  ;;  %v292_v17 = vpop.xlane.xlu0 %291 }
  0xf9   : > { %v328_v21 = vrot.slane %v319_v16, %v302_v18  ;;  %v303_v22 = vrot.slane %v292_v17, %v302_v18 }
  0xfc   : > { %v322_v19 = vpop.xlane.xlu1 %321  ;;  %v295_v20 = vpop.xlane.xlu0 %294 }
  0xfd   : > { %v332_v24 = vrot.slane %v322_v19, %v302_v18  ;;  %v307_v26 = vrot.slane %v295_v20, %v302_v18 }
  0xff   : > { %v333_v27 = vsel %vm308_vm2, %v332_v24, %v328_v21  ;;  %v309_v28 = vsel %vm308_vm2, %v307_v26, %v303_v22 }
 0x100   : > { %v335_v29 = vadd.f32 %v333_v27, %v314_v23  ;;  %v311_v30 = vadd.f32 %v309_v28, %v286_v25  ;;  %v345_v31 = vpop.xlane.xlu1 %344  ;;  %v342_v32 = vpop.xlane.xlu0 %341 }
 0x101   : > { %v355_v33 = vrot.slane %v345_v31, %v302_v18  ;;  %v351_v35 = vrot.slane %v342_v32, %v302_v18 }
 0x102   : > { %336 = vst.msk [vmem:[#allocation3] sm:$0x3] %vm312_vm3, %v335_v29  ;;  %313 = vst.msk [vmem:[#allocation2] sm:$0x3] %vm312_vm3, %v311_v30  ;;  %363 = sbr.rel (%p1515_p4) target bundleno = 2475 (0x9ab), region = 56 }
 0x103   : > { %v356_v36 = vsel %vm308_vm2, %v355_v33, %v351_v35 }
 0x104   : > { %v358_v37 = vadd.f32 %v356_v36, %v337_v34 }
 0x106   : > { %359 = vst.msk [vmem:[#allocation4] sm:$0x3] %vm312_vm3, %v358_v37 }
 0x107   : > { %v364_v38 = vld [vmem:[%s2201_s3] sm:$0xf]  ;;  %v1894_v40 = vmov 0.0   ;;  %vm1895_vm4 = vmmov 0   ;;  %vm367_vm5 = vcmask 31744   ;;  %vm444_vm6 = vcmask 74752  }
 0x108   : > { %1568 = vmatprep.subr.mxu0 %v1894_v40  ;;  %1570 = vmatprep.mubr.msk.f32.mxu0 %vm1895_vm4, %v1894_v40  ;;  %vm667_vm7 = vcmask 1041408   ;;  %vm660_vm8 = vcmask 15360   ;;  %vm862_vm9 = vcmask 80896   ;;  %vm1399_vm10 = vcmask 0  }
 0x109   : > { %v365_v39 = vld [vmem:[#allocation2] sm:$0x3]  ;;  %v456_v42 = vld [vmem:[#allocation3] sm:$0x3]  ;;  %1569 = vmatpush3.msk.msra.mxu0 %vm289_vm1, %v364_v38  ;;  %1573 = vmatprep.subr.mxu1 %v1894_v40 }
 0x10a   : > { %v366_v41 = vmul.f32 0.00390625, %v365_v39  ;;  %v457_v43 = vmul.f32 0.00390625, %v456_v42  ;;  %1574 = vmatpush3.msk.msra.mxu1 %vm289_vm1, %v364_v38  ;;  %1575 = vmatprep.mubr.msk.f32.mxu1 %vm1895_vm4, %v1894_v40 }
 0x10b   : > { %1578 = vmatprep.subr.mxu0 %v1894_v40 }
 0x10c   : > { %1571 = vmatmul.mubr.msk.f32.vlgmr.msra.gmra.mxu0 %vm367_vm5, %v366_v41  ;;  %1576 = vmatmul.mubr.msk.f32.vlgmr.msra.gmra.mxu1 %vm367_vm5, %v457_v43 }
 0x10d   : > { %1579 = vmatpush3.msk.msra.mxu0 %vm289_vm1, %v364_v38  ;;  %1580 = vmatprep.mubr.msk.f32.mxu0 %vm1895_vm4, %v1894_v40  ;;  %v542_v44 = vld [vmem:[#allocation4] sm:$0x3] }
 0x10e   : > { %v543_v45 = vmul.f32 0.00390625, %v542_v44 }
 0x110   : > { %1581 = vmatmul.mubr.msk.f32.vlgmr.msra.gmra.mxu0 %vm367_vm5, %v543_v45 }
 0x1cc   : > { %v440_v46 = vpop.f32.mrf.mxu0  ;;  %v527_v49 = vpop.f32.mrf.mxu1 }
 0x1cd   : > { %v445_v47 = vsel %vm444_vm6, %v440_v46, -inf  ;;  %v531_v50 = vsel %vm444_vm6, %v527_v49, -inf }
 0x1ce   : > { %446 = vmax.xlane.f32.xlu0 %v445_v47  ;;  %v1572_v48 = vpop.f32.mrf.mxu0  ;;  %v1577_v51 = vpop.f32.mrf.mxu1 }
 0x1d0   : > { %v613_v52 = vpop.f32.mrf.mxu0 }
 0x1d1   : > { %v617_v0 = vsel %vm444_vm6, %v613_v52, -inf }
 0x1d2   : > { %532 = vmax.xlane.f32.xlu0 %v531_v50  ;;  %v1582_v53 = vpop.f32.mrf.mxu0 }
 0x257   : > { %v447_v54 = vpop.xlane.xlu0 %446 }
 0x258   : > { %v448_v55 = vsub.f32 %v440_v46, %v447_v54 }
 0x25a   : > { %v449_v56 = vmul.f32 1.442695, %v448_v55 }
 0x25b   : > { %v533_v57 = vpop.xlane.xlu0 %532 }
 0x25c   : > { %1687 = vpow2.f32 %v449_v56  ;;  %v534_v58 = vsub.f32 %v527_v49, %v533_v57 }
 0x25e   : > { %v535_v59 = vmul.f32 1.442695, %v534_v58 }
 0x260   : > { %1689 = vpow2.f32 %v535_v59 }
 0x269   : > { %v1688_v60 = vpop.eup %1687 }
 0x26a   : > { %v451_v61 = vsel %vm444_vm6, %v1688_v60, 0.0 }
 0x26b   : > { %452 = vadd.xlane.f32.xlu1 %v451_v61 }
 0x26d   : > { %v1690_v62 = vpop.eup %1689 }
 0x26e   : > { %v537_v63 = vsel %vm444_vm6, %v1690_v62, 0.0 }
 0x26f   : > { %538 = vadd.xlane.f32.xlu1 %v537_v63 }
 0x273   : > { %618 = vmax.xlane.f32.xlu1 %v617_v0 }
 0x2f4   : > { %v453_v1 = vpop.xlane.xlu1 %452 }
 0x2f5   : > { %1691 = vrcp.f32 %v453_v1 }
 0x2f8   : > { %v539_v2 = vpop.xlane.xlu1 %538 }
 0x2f9   : > { %1693 = vrcp.f32 %v539_v2 }
 0x2fc   : > { %v619_v7 = vpop.xlane.xlu1 %618 }
 0x2fd   : > { %v620_v8 = vsub.f32 %v613_v52, %v619_v7 }
 0x2ff   : > { %v621_v9 = vmul.f32 1.442695, %v620_v8 }
 0x301   : > { %1695 = vpow2.f32 %v621_v9 }
 0x302   : > { %v1692_v3 = vpop.eup %1691 }
 0x303   : > { %v455_v4 = vmul.f32 %v1692_v3, %v1688_v60 }
 0x305   : > { %628 = vxpose.xlu0.b32.start.end [1/1] (short) (narrow) %v455_v4, 16  ;;  %1588 = vmatprep.subr.msk.mxu0 %vm667_vm7, %v455_v4 }
 0x306   : > { %v1694_v5 = vpop.eup %1693  ;;  %1589 = vmatpush3.msk.msra.mxu0 %vm667_vm7, %v455_v4 }
 0x307   : > { %v541_v6 = vmul.f32 %v1694_v5, %v1690_v62 }
 0x309   : > { %1583 = vmatprep.subr.msk.mxu1 %vm667_vm7, %v541_v6  ;;  %1598 = vmatprep.subr.msk.mxu0 %vm667_vm7, %v541_v6 }
 0x30a   : > { %746 = vxpose.xlu1.b32.start.end [1/1] (short) (narrow) %v541_v6, 16  ;;  %1584 = vmatpush3.msk.msra.mxu1 %vm667_vm7, %v541_v6 }
 0x30e   : > { %v1696_v10 = vpop.eup %1695 }
 0x30f   : > { %v623_v11 = vsel %vm444_vm6, %v1696_v10, 0.0 }
 0x336   : > { %624 = vadd.xlane.f32.xlu0 %v623_v11 }
 0x381   : > { %v644_v12 = vpop.trf.xlu0 }
 0x382   : > { %1585 = vmatprep.mubr.msk.f32.mxu1 %vm660_vm8, %v644_v12 }
 0x385   : > { %v645_v13 = vpop.trf.xlu0 }
 0x386   : > { %v762_v14 = vpop.trf.xlu1  ;;  %1586 = vmatmul.mubr.msk.f32.vlgmr.msra.gmra.mxu1 %vm660_vm8, %v645_v13 }
 0x387   : > { %1590 = vmatprep.mubr.msk.f32.mxu0 %vm660_vm8, %v762_v14  ;;  %1595 = vmatprep.mubr.msk.f32.mxu1 %vm660_vm8, %v762_v14 }
 0x38a   : > { %v763_v15 = vpop.trf.xlu1 }
 0x38b   : > { %1591 = vmatmul.mubr.msk.f32.vlgmr.msra.gmra.mxu0 %vm660_vm8, %v763_v15 }
 0x38c   : > { %1599 = vmatpush3.msk.msra.mxu0 %vm667_vm7, %v541_v6 }
 0x3bf   : > { %v625_v16 = vpop.xlane.xlu0 %624 }
 0x3c0   : > { %1697 = vrcp.f32 %v625_v16 }
 0x3cd   : > { %v1698_v17 = vpop.eup %1697 }
 0x3ce   : > { %v627_v18 = vmul.f32 %v1698_v17, %v1696_v10 }
 0x3d0   : > { %1593 = vmatprep.subr.msk.mxu1 %vm667_vm7, %v627_v18  ;;  %1608 = vmatprep.subr.msk.mxu0 %vm667_vm7, %v627_v18 }
 0x3d1   : > { %1594 = vmatpush3.msk.msra.mxu1 %vm667_vm7, %v627_v18 }
 0x3d2   : > { %1603 = vmatprep.subr.msk.mxu1 %vm667_vm7, %v455_v4  ;;  %1596 = vmatmul.mubr.msk.f32.vlgmr.msra.gmra.mxu1 %vm660_vm8, %v763_v15 }
 0x3d3   : > { %1604 = vmatpush3.msk.msra.mxu1 %vm667_vm7, %v455_v4 }
 0x446   : > { %v1587_v19 = vpop.f32.mrf.mxu1 }
 0x447   : > { %v864_v21 = vsel %vm444_vm6, %v1587_v19, 0.0 }
 0x448   : > { %v737_v20 = vpop.f32.mrf.mxu1 }
 0x449   : > { %v863_v22 = vsel %vm862_vm9, %v737_v20, 0.0 }
 0x44a   : > { %v865_v23 = vadd.f32 %v864_v21, %v863_v22 }
 0x44b   : > { %v1592_v34 = vpop.f32.mrf.mxu0 }
 0x44c   : > { %866 = vadd.xlane.f32.xlu1 %v865_v23  ;;  %v876_v36 = vadd.f32 %v1592_v34, %v1587_v19 }
 0x44d   : > { %v853_v35 = vpop.f32.mrf.mxu0 }
 0x44e   : > { %v875_v37 = vadd.f32 %v853_v35, %v737_v20  ;;  %v878_v38 = vmul.f32 0.5, %v876_v36 }
 0x450   : > { %v877_v39 = vmul.f32 0.5, %v875_v37 }
 0x47f   : > { %1005 = vxpose.xlu1.b32.start.end [1/1] (short) (narrow) %v627_v18, 16 }
 0x492   : > { %v1597_v5 = vpop.f32.mrf.mxu1 }
 0x494   : > { %v996_v9 = vpop.f32.mrf.mxu1 }
 0x495   : > { %v1118_v14 = vsel %vm862_vm9, %v996_v9, 0.0 }
 0x4d5   : > { %v867_v24 = vpop.xlane.xlu1 %866 }
 0x4d6   : > { %v868_v25 = vrot.slane %v867_v24, 4 }
 0x4d8   : > { %v869_v26 = vadd.f32 %v868_v25, %v867_v24 }
 0x4da   : > { %v870_v27 = vrot.slane %v869_v26, 2 }
 0x4dc   : > { %v871_v28 = vadd.f32 %v870_v27, %v869_v26 }
 0x4de   : > { %v872_v29 = vrot.slane %v871_v28, 1 }
 0x4e0   : > { %v873_v30 = vadd.f32 %v872_v29, %v871_v28 }
 0x4e2   : > { %1613 = vpush %v873_v30 }
 0x4fb   : > { %v1021_v31 = vpop.trf.xlu1 }
 0x4fc   : > { %1600 = vmatprep.mubr.msk.f32.mxu0 %vm660_vm8, %v1021_v31  ;;  %1605 = vmatprep.mubr.msk.f32.mxu1 %vm660_vm8, %v1021_v31 }
 0x4ff   : > { %v1022_v32 = vpop.trf.xlu1 }
 0x500   : > { %1601 = vmatmul.mubr.msk.f32.vlgmr.msra.gmra.mxu0 %vm660_vm8, %v1022_v32  ;;  %1606 = vmatmul.mubr.msk.f32.vlgmr.msra.gmra.mxu1 %vm660_vm8, %v1022_v32 }
 0x501   : > { %1609 = vmatpush3.msk.msra.mxu0 %vm667_vm7, %v627_v18  ;;  %1610 = vmatprep.mubr.msk.f32.mxu0 %vm660_vm8, %v644_v12 }
 0x504   : > { %1611 = vmatmul.mubr.msk.f32.vlgmr.msra.gmra.mxu0 %vm660_vm8, %v645_v13  ;;  %v1119_v13 = vsel %vm444_vm6, %v1597_v5, 0.0 }
 0x505   : > { %v1120_v15 = vadd.f32 %v1119_v13, %v1118_v14 }
 0x513   : > { %s1614_s21 = spop %1613 }
 0x514   : > { %v879_v33 = vstv %s1614_s21 }
 0x515   : > { %1699 = vrcp.f32 %v879_v33 }
 0x522   : > { %v1700_v40 = vpop.eup %1699 }
 0x523   : > { %v881_v41 = vmul.f32 %v1700_v40, %v877_v39  ;;  %v882_v42 = vmul.f32 %v1700_v40, %v878_v38 }
 0x525   : > { %v883_v43 = vmax.f32 %v881_v41, 1e-10  ;;  %v884_v44 = vmax.f32 %v882_v42, 1e-10 }
 0x527   : > { %v885_v45 = vsel %vm862_vm9, %v883_v43, 0.0  ;;  %v888_v46 = vsel %vm444_vm6, %v884_v44, 0.0 }
 0x528   : > { %886 = vadd.xlane.f32.xlu0 %v885_v45  ;;  %v891_v47 = vadd.f32 %v888_v46, %v885_v45 }
 0x52a   : > { %v892_v48 = vrot.slane %v891_v47, 4 }
 0x52c   : > { %889 = vadd.xlane.f32.xlu0 %v888_v46  ;;  %v893_v49 = vadd.f32 %v892_v48, %v891_v47 }
 0x52e   : > { %v894_v50 = vrot.slane %v893_v49, 2 }
 0x530   : > { %v895_v51 = vadd.f32 %v894_v50, %v893_v49 }
 0x532   : > { %v896_v52 = vrot.slane %v895_v51, 1 }
 0x534   : > { %v897_v53 = vadd.f32 %v896_v52, %v895_v51 }
 0x536   : > { %1701 = vlog2.f32 %v897_v53 }
 0x537   : > { %1703 = vlog2.f32 %v883_v43 }
 0x543   : > { %v1702_v56 = vpop.eup %1701 }
 0x544   : > { %v1704_v57 = vpop.eup %1703  ;;  %v903_v60 = vmul.f32 0.6931472, %v1702_v56 }
 0x545   : > { %v907_v63 = vmul.f32 0.6931472, %v1704_v57 }
 0x5b1   : > { %v887_v54 = vpop.xlane.xlu0 %886 }
 0x5b2   : > { %1705 = vlog2.f32 %v887_v54 }
 0x5b3   : > { %1707 = vlog2.f32 %v884_v44 }
 0x5b5   : > { %v890_v55 = vpop.xlane.xlu0 %889 }
 0x5b6   : > { %1709 = vlog2.f32 %v890_v55 }
 0x5bf   : > { %v1706_v58 = vpop.eup %1705 }
 0x5c0   : > { %v899_v59 = vmul.f32 0.6931472, %v1706_v58  ;;  %v1708_v61 = vpop.eup %1707  ;;  %v1602_v31 = vpop.f32.mrf.mxu0 }
 0x5c1   : > { %v909_v4 = vmul.f32 0.6931472, %v1708_v61  ;;  %v1131_v33 = vadd.f32 %v1602_v31, %v1597_v5 }
 0x5c2   : > { %v904_v62 = vadd.f32 %v903_v60, %v899_v59  ;;  %v1109_v32 = vpop.f32.mrf.mxu0 }
 0x5c3   : > { %v1710_v0 = vpop.eup %1709  ;;  %v1130_v34 = vadd.f32 %v1109_v32, %v996_v9  ;;  %v1133_v35 = vmul.f32 0.5, %v1131_v33 }
 0x5c4   : > { %v901_v1 = vmul.f32 0.6931472, %v1710_v0  ;;  %v910_v2 = vsub.f32 %v904_v62, %v907_v63  ;;  %v1612_v31 = vpop.f32.mrf.mxu0 }
 0x5c5   : > { %v1132_v36 = vmul.f32 0.5, %v1130_v34 }
 0x5c6   : > { %v905_v3 = vadd.f32 %v903_v60, %v901_v1  ;;  %v912_v7 = vmul.f32 %v910_v2, %v883_v43  ;;  %v1324_v32 = vpop.f32.mrf.mxu0 }
 0x5c8   : > { %v911_v6 = vsub.f32 %v905_v3, %v909_v4  ;;  %v914_v10 = vsel %vm862_vm9, %v912_v7, 0.0  ;;  %v1607_v4 = vpop.f32.mrf.mxu1 }
 0x5c9   : > { %v1346_v33 = vadd.f32 %v1612_v31, %v1607_v4 }
 0x5ca   : > { %v913_v8 = vmul.f32 %v911_v6, %v884_v44 }
 0x5cc   : > { %v915_v11 = vsel %vm444_vm6, %v913_v8, 0.0  ;;  %v1249_v8 = vpop.f32.mrf.mxu1 }
 0x5cd   : > { %v916_v12 = vadd.f32 %v915_v11, %v914_v10  ;;  %v1334_v10 = vsel %vm444_vm6, %v1607_v4, 0.0  ;;  %v1333_v11 = vsel %vm862_vm9, %v1249_v8, 0.0  ;;  %v1345_v34 = vadd.f32 %v1324_v32, %v1249_v8 }
 0x5cf   : > { %917 = vadd.xlane.f32.xlu0 %v916_v12  ;;  %v1335_v12 = vadd.f32 %v1334_v10, %v1333_v11 }
 0x5d3   : > { %1121 = vadd.xlane.f32.xlu0 %v1120_v15 }
 0x658   : > { %v918_v16 = vpop.xlane.xlu0 %917 }
 0x659   : > { %v919_v17 = vrot.slane %v918_v16, 4 }
 0x65b   : > { %v920_v18 = vadd.f32 %v919_v17, %v918_v16 }
 0x65c   : > { %v1122_v19 = vpop.xlane.xlu0 %1121 }
 0x65d   : > { %v921_v20 = vrot.slane %v920_v18, 2  ;;  %v1123_v21 = vrot.slane %v1122_v19, 4 }
 0x65f   : > { %v1124_v22 = vadd.f32 %v1123_v21, %v1122_v19  ;;  %v922_v23 = vadd.f32 %v921_v20, %v920_v18 }
 0x661   : > { %v1125_v24 = vrot.slane %v1124_v22, 2  ;;  %v923_v25 = vrot.slane %v922_v23, 1 }
 0x663   : > { %v924_v26 = vadd.f32 %v923_v25, %v922_v23  ;;  %v1126_v27 = vadd.f32 %v1125_v24, %v1124_v22 }
 0x665   : > { %1615 = vpush %v924_v26  ;;  %v1127_v28 = vrot.slane %v1126_v27, 1 }
 0x667   : > { %v1128_v29 = vadd.f32 %v1127_v28, %v1126_v27 }
 0x669   : > { %1617 = vpush %v1128_v29 }
 0x696   : > { %s2157_s13 = spop %1615 }
 0x697   : > { %v926_v27 = vstv %s2157_s13 }
 0x69a   : > { %s1618_s25 = spop %1617 }
 0x69b   : > { %v1134_v30 = vstv %s1618_s25 }
 0x69c   : > { %1711 = vrcp.f32 %v1134_v30 }
 0x6a9   : > { %v1712_v37 = vpop.eup %1711 }
 0x6aa   : > { %v1136_v38 = vmul.f32 %v1712_v37, %v1132_v36  ;;  %v1137_v39 = vmul.f32 %v1712_v37, %v1133_v35  ;;  %v1348_v35 = vmul.f32 0.5, %v1346_v33  ;;  %v1347_v36 = vmul.f32 0.5, %v1345_v34 }
 0x6ac   : > { %v1138_v40 = vmax.f32 %v1136_v38, 1e-10  ;;  %v1139_v41 = vmax.f32 %v1137_v39, 1e-10 }
 0x6ae   : > { %v1140_v42 = vsel %vm862_vm9, %v1138_v40, 0.0  ;;  %v1143_v43 = vsel %vm444_vm6, %v1139_v41, 0.0 }
 0x6af   : > { %1141 = vadd.xlane.f32.xlu0 %v1140_v42  ;;  %v1146_v44 = vadd.f32 %v1143_v43, %v1140_v42 }
 0x6b1   : > { %v1147_v45 = vrot.slane %v1146_v44, 4 }
 0x6b3   : > { %1144 = vadd.xlane.f32.xlu0 %v1143_v43  ;;  %v1148_v46 = vadd.f32 %v1147_v45, %v1146_v44 }
 0x6b5   : > { %v1149_v47 = vrot.slane %v1148_v46, 2 }
 0x6b7   : > { %v1150_v48 = vadd.f32 %v1149_v47, %v1148_v46 }
 0x6b9   : > { %v1151_v49 = vrot.slane %v1150_v48, 1 }
 0x6bb   : > { %v1152_v50 = vadd.f32 %v1151_v49, %v1150_v48 }
 0x6bd   : > { %1713 = vlog2.f32 %v1152_v50 }
 0x6be   : > { %1715 = vlog2.f32 %v1138_v40 }
 0x6ca   : > { %v1714_v53 = vpop.eup %1713 }
 0x6cb   : > { %v1716_v54 = vpop.eup %1715  ;;  %v1158_v57 = vmul.f32 0.6931472, %v1714_v53 }
 0x6cc   : > { %v1162_v60 = vmul.f32 0.6931472, %v1716_v54 }
 0x738   : > { %v1142_v51 = vpop.xlane.xlu0 %1141 }
 0x739   : > { %1717 = vlog2.f32 %v1142_v51 }
 0x73a   : > { %1719 = vlog2.f32 %v1139_v41 }
 0x73c   : > { %v1145_v52 = vpop.xlane.xlu0 %1144 }
 0x73d   : > { %1721 = vlog2.f32 %v1145_v52 }
 0x746   : > { %v1718_v55 = vpop.eup %1717 }
 0x747   : > { %v1154_v56 = vmul.f32 0.6931472, %v1718_v55  ;;  %v1720_v58 = vpop.eup %1719 }
 0x748   : > { %v1164_v1 = vmul.f32 0.6931472, %v1720_v58 }
 0x749   : > { %v1159_v59 = vadd.f32 %v1158_v57, %v1154_v56 }
 0x74a   : > { %v1722_v61 = vpop.eup %1721 }
 0x74b   : > { %v1156_v62 = vmul.f32 0.6931472, %v1722_v61  ;;  %v1165_v63 = vsub.f32 %v1159_v59, %v1162_v60 }
 0x74d   : > { %v1160_v0 = vadd.f32 %v1158_v57, %v1156_v62  ;;  %v1167_v3 = vmul.f32 %v1165_v63, %v1138_v40 }
 0x74f   : > { %v1166_v2 = vsub.f32 %v1160_v0, %v1164_v1  ;;  %v1169_v6 = vsel %vm862_vm9, %v1167_v3, 0.0 }
 0x751   : > { %v1168_v5 = vmul.f32 %v1166_v2, %v1139_v41 }
 0x753   : > { %v1170_v7 = vsel %vm444_vm6, %v1168_v5, 0.0 }
 0x754   : > { %v1171_v9 = vadd.f32 %v1170_v7, %v1169_v6 }
 0x756   : > { %1172 = vadd.xlane.f32.xlu0 %v1171_v9 }
 0x75a   : > { %1336 = vadd.xlane.f32.xlu0 %v1335_v12 }
 0x7df   : > { %v1173_v13 = vpop.xlane.xlu0 %1172 }
 0x7e0   : > { %v1174_v14 = vrot.slane %v1173_v13, 4 }
 0x7e2   : > { %v1175_v15 = vadd.f32 %v1174_v14, %v1173_v13 }
 0x7e3   : > { %v1337_v16 = vpop.xlane.xlu0 %1336 }
 0x7e4   : > { %v1176_v17 = vrot.slane %v1175_v15, 2  ;;  %v1338_v18 = vrot.slane %v1337_v16, 4 }
 0x7e6   : > { %v1339_v19 = vadd.f32 %v1338_v18, %v1337_v16  ;;  %v1177_v20 = vadd.f32 %v1176_v17, %v1175_v15 }
 0x7e8   : > { %v1340_v21 = vrot.slane %v1339_v19, 2  ;;  %v1178_v22 = vrot.slane %v1177_v20, 1 }
 0x7ea   : > { %v1179_v23 = vadd.f32 %v1178_v22, %v1177_v20  ;;  %v1341_v24 = vadd.f32 %v1340_v21, %v1339_v19 }
 0x7ec   : > { %1619 = vpush %v1179_v23  ;;  %v1342_v25 = vrot.slane %v1341_v24, 1 }
 0x7ee   : > { %v1343_v26 = vadd.f32 %v1342_v25, %v1341_v24 }
 0x7f0   : > { %1621 = vpush %v1343_v26 }
 0x81d   : > { %s1620_s18 = spop %1619 }
 0x81e   : > { %v1181_v28 = vstv %s1620_s18 }
 0x81f   : > { %v2166_v29 = vadd.f32 %v1181_v28, %v926_v27 }
 0x821   : > { %s1622_s15 = spop %1621 }
 0x822   : > { %v1349_v30 = vstv %s1622_s15 }
 0x823   : > { %1723 = vrcp.f32 %v1349_v30 }
 0x830   : > { %v1724_v37 = vpop.eup %1723 }
 0x831   : > { %v1351_v38 = vmul.f32 %v1724_v37, %v1347_v36  ;;  %v1352_v39 = vmul.f32 %v1724_v37, %v1348_v35 }
 0x833   : > { %v1353_v40 = vmax.f32 %v1351_v38, 1e-10  ;;  %v1354_v41 = vmax.f32 %v1352_v39, 1e-10 }
 0x835   : > { %v1355_v42 = vsel %vm862_vm9, %v1353_v40, 0.0  ;;  %v1358_v43 = vsel %vm444_vm6, %v1354_v41, 0.0 }
 0x836   : > { %1356 = vadd.xlane.f32.xlu0 %v1355_v42  ;;  %v1361_v44 = vadd.f32 %v1358_v43, %v1355_v42 }
 0x838   : > { %v1362_v45 = vrot.slane %v1361_v44, 4 }
 0x83a   : > { %1359 = vadd.xlane.f32.xlu0 %v1358_v43  ;;  %v1363_v46 = vadd.f32 %v1362_v45, %v1361_v44 }
 0x83c   : > { %v1364_v47 = vrot.slane %v1363_v46, 2 }
 0x83e   : > { %v1365_v48 = vadd.f32 %v1364_v47, %v1363_v46 }
 0x840   : > { %v1366_v49 = vrot.slane %v1365_v48, 1 }
 0x842   : > { %v1367_v50 = vadd.f32 %v1366_v49, %v1365_v48 }
 0x844   : > { %1725 = vlog2.f32 %v1367_v50 }
 0x845   : > { %1727 = vlog2.f32 %v1353_v40 }
 0x851   : > { %v1726_v53 = vpop.eup %1725 }
 0x852   : > { %v1728_v54 = vpop.eup %1727  ;;  %v1373_v57 = vmul.f32 0.6931472, %v1726_v53 }
 0x853   : > { %v1377_v60 = vmul.f32 0.6931472, %v1728_v54 }
 0x8bf   : > { %v1357_v51 = vpop.xlane.xlu0 %1356 }
 0x8c0   : > { %1729 = vlog2.f32 %v1357_v51 }
 0x8c1   : > { %1731 = vlog2.f32 %v1354_v41 }
 0x8c3   : > { %v1360_v52 = vpop.xlane.xlu0 %1359 }
 0x8c4   : > { %1733 = vlog2.f32 %v1360_v52 }
 0x8cd   : > { %v1730_v55 = vpop.eup %1729 }
 0x8ce   : > { %v1369_v56 = vmul.f32 0.6931472, %v1730_v55  ;;  %v1732_v58 = vpop.eup %1731 }
 0x8cf   : > { %v1379_v1 = vmul.f32 0.6931472, %v1732_v58 }
 0x8d0   : > { %v1374_v59 = vadd.f32 %v1373_v57, %v1369_v56 }
 0x8d1   : > { %v1734_v61 = vpop.eup %1733 }
 0x8d2   : > { %v1371_v62 = vmul.f32 0.6931472, %v1734_v61  ;;  %v1380_v63 = vsub.f32 %v1374_v59, %v1377_v60 }
 0x8d4   : > { %v1375_v0 = vadd.f32 %v1373_v57, %v1371_v62  ;;  %v1382_v3 = vmul.f32 %v1380_v63, %v1353_v40 }
 0x8d6   : > { %v1381_v2 = vsub.f32 %v1375_v0, %v1379_v1  ;;  %v1384_v5 = vsel %vm862_vm9, %v1382_v3, 0.0 }
 0x8d8   : > { %v1383_v4 = vmul.f32 %v1381_v2, %v1354_v41 }
 0x8da   : > { %v1385_v6 = vsel %vm444_vm6, %v1383_v4, 0.0 }
 0x8db   : > { %v1386_v7 = vadd.f32 %v1385_v6, %v1384_v5 }
 0x8dd   : > { %1387 = vadd.xlane.f32.xlu0 %v1386_v7 }
 0x966   : > { %v1388_v8 = vpop.xlane.xlu0 %1387 }
 0x967   : > { %v1389_v9 = vrot.slane %v1388_v8, 4 }
 0x969   : > { %v1390_v10 = vadd.f32 %v1389_v9, %v1388_v8 }
 0x96b   : > { %v1391_v11 = vrot.slane %v1390_v10, 2 }
 0x96d   : > { %v1392_v12 = vadd.f32 %v1391_v11, %v1390_v10 }
 0x96f   : > { %v1393_v13 = vrot.slane %v1392_v12, 1 }
 0x971   : > { %v1394_v14 = vadd.f32 %v1393_v13, %v1392_v12 }
 0x973   : > { %1623 = vpush %v1394_v14 }
 0x9a4   : > { %s1624_s29 = spop %1623 }
 0x9a5   : > { %v1396_v15 = vstv %s1624_s29 }
 0x9a6   : > { %v1397_v16 = vadd.f32 %v1396_v15, %v2166_v29 }
 0x9a8   : > { %v1398_v17 = vmul.f32 0.16666667, %v1397_v16 }
 0x9aa   : > { %1400 = vst.msk [vmem:[#allocation11] sm:$0x1] %vm1399_vm10, %v1398_v17 }
 0x9ab PF: > { %p1646_p5 = scmp.eq.s32.totalorder %s1941_s19, 1  ;;  %s1896_s6 = smov [#allocation11]  }
 0x9ac   : > { %s1408_s26 = sshll.u32 %s1896_s6, 4  ;;  %s1409_s26 = int_to_ptr.vmem [resolvable:$true] %s1408_s26 }
 0x9ad   : > { %s1819_s27 = scalar_lea.vmem %s1409_s26, 16  ;;  %s1825_s8 = scalar_lea.vmem %s1409_s26, 32 }
 0x9ae   : > { %p1820_p6 = scmp.ne.s32.totalorder %s1409_s26, %s1819_s27  ;;  %p1826_p9 = scmp.lt.s32.totalorder %s1409_s26, %s1409_s26 }
 0x9af   : > { %p1827_p7 = scmp.lt.s32.totalorder %s1825_s8, %s1819_s27 }
 0x9b0   : > { %p1821_p10 = pnand %p1820_p6, %p1646_p5 }
 0x9b1   : > { %p1828_p0 = por %p1827_p7, %p1826_p9 }
 0x9b2   : > { %p1822_p12 = pneg %p1821_p10 }
 0x9b4   : > { %p1829_p1 = pnand %p1828_p0, %p1822_p12 }
 0x9b6   : > { %1832 = shalt.err (!%p1829_p1)
}
 0x9b7   : > { %1632 = dma.vmem_to_hbm [thread:$0]  (%p1646_p5), %s1409_s26, 16, %s2202_s4, [#allocation7]  }
 0x9b8   : > { %1868 = dma.done.wait (%p1646_p5), [#allocation7], 16  }
 0x9b9   : > { %1870 = vsyncadd (%p1646_p5), [#allocation7], 4294967280 }
 0x9ba PF: > { %p18_p13 = scmp.ge.s32.totalorder %s1944_s20, 4   ;;  %s2211_s15 = smov %s1877_s16 }
 0x9bb   : > { %s2212_s16 = smov %s1881_s17  ;;  %s2213_s17 = smov %s1954_s23 }
 0x9bc   : > { %s2214_s18 = smov %s1944_s20  ;;  %20 = sbr.rel (!%p18_p13) target bundleno = 6 (0x6), region = 105 }
 0x9c1   :  { %1421 = vsyncpa [#allocation6], 1 }
 0x9c2   :  { %1423 = vsyncpa [#allocation6 + $0x1], 1 }
 0x9c3   :  { %1424 = vsyncpa [#allocation9], 1 }
 0x9c4   :  { %1426 = vsyncpa [#allocation9 + $0x1], 1 }
 0x9c5   :  { %1427 = vsyncpa [#allocation7], 1 }
 0x9c6   :  { %1429 = vsyncpa [#allocation7 + $0x1], 1 }

</bundles_post_ra>
